<compile_context>
chip_gen: v7x
topology: tpu7x:2x2x1
jax: 0.10.0
libtpu: 0.0.40
codegen_flags: <defaults>
</compile_context>

<pallas_src>
import jax
import jax.numpy as jnp
from jax.experimental import pallas as pl
from jax.experimental.pallas import tpu as pltpu


# ----------------------------------------------------------------------------
# kernel
# ----------------------------------------------------------------------------
def _make_kernel(batch_tile, seq_len, hidden_p, matmul_dtype, approx_recip):
    Bt, S, Hp = batch_tile, seq_len, hidden_p

    def kernel(x_ref, w1_ref, b1_ref, w2_ref, b2_ref, o_ref, t_ref):
        # x_ref:  (Bt, S, Hp)    batch tile of hidden_states (matmul_dtype)
        # w1_ref: (Hp, H2p)      feature_transform weight (stored [in, out])
        # b1_ref: (1, H2p)       feature_transform bias (f32)
        # w2_ref: (H2p, tL)      attention_weights weight tile (stored [in, out])
        # b2_ref: (1, tL)        attention_weights bias tile (f32)
        # o_ref:  (Bt, tL, Hp)   label-features output tile
        # t_ref:  (Bt*S, H2p)    scratch: tanh(x @ w1 + b1), reused across L tiles
        tL = w2_ref.shape[1]

        # Transformed features: compute once per batch tile (first label tile
        # only); the scratch persists across the inner, sequential label axis.
        @pl.when(pl.program_id(1) == 0)
        def _():
            x2d = x_ref[...].reshape(Bt * S, Hp)
            t = jnp.dot(x2d, w1_ref[...],
                        preferred_element_type=jnp.float32) + b1_ref[...]
            t_ref[...] = jnp.tanh(t).astype(matmul_dtype)

        # Attention logits for this label tile, all batch rows stacked (f32).
        logits = (jnp.dot(t_ref[...], w2_ref[...],
                          preferred_element_type=jnp.float32)
                  + b2_ref[...])                                  # (Bt*S, tL)

        # Batched softmax over the sequence axis (axis=1), f32 math.
        lg = logits.reshape(Bt, S, tL)
        m = jnp.max(lg, axis=1, keepdims=True)                    # (Bt,1,tL)
        e = jnp.exp(lg - m)
        denom = jnp.sum(e, axis=1, keepdims=True)
        attn = (e * pl.reciprocal(denom, approx=approx_recip)
                ).astype(matmul_dtype)                            # (Bt,S,tL)

        # Only the per-b MXU matmul + store stay in the (small, <=8) unroll.
        for b in range(Bt):
            out_b = jax.lax.dot_general(
                attn[b], x_ref[b],
                dimension_numbers=(((0,), (0,)), ((), ())),       # attn^T @ x
                preferred_element_type=jnp.float32)               # (tL, Hp)
            o_ref[b] = out_b.astype(o_ref.dtype)

    return kernel


# ----------------------------------------------------------------------------
# tiling helpers
# ----------------------------------------------------------------------------
def _round_up(x, m):
    return ((x + m - 1) // m) * m


def _tpu_config():
    """(vmem_capacity, vmem_limit_bytes, tensorcores_per_chip)."""
    try:
        vmem_cap = int(pltpu.get_tpu_info().vmem_capacity_bytes)
    except Exception:
        vmem_cap = 128 << 20
    # v7x has 64 MiB VMEM per TensorCore and 2 TCs/chip; v5e/v6e have 128 MiB
    # and 1 TC.  Use VMEM size as the generation proxy.
    num_cores = 2 if vmem_cap <= (64 << 20) else 1
    vmem_limit = max(32 << 20, min(vmem_cap - (16 << 20), 96 << 20))
    return vmem_cap, vmem_limit, num_cores


def _pick_tiles(B, S, Hp, H2p, L, in_bytes, out_bytes, vmem_budget, num_cores):
    """Pick (Bt, tL, Lp) from a full per-step VMEM working-set budget."""
    Lp = _round_up(max(L, 1), 128)
    tl_candidates = [t for t in (512, 384, 256, 128) if t <= Lp and Lp % t == 0]
    if not tl_candidates:
        tl_candidates = [128]

    # Cap the per-step Python unroll at 8 rows; on 2-core chips also keep
    # nB = B/Bt >= 2 so both TensorCores get a batch tile.
    max_bt = min(B, 8)
    if num_cores >= 2 and B >= 2:
        max_bt = max(1, min(max_bt, B // 2))

    def divisors_desc(n, cap):
        return [d for d in range(min(cap, n), 0, -1) if n % d == 0]

    def working_set(bt, tl):
        ws = 0
        ws += 2 * bt * S * Hp * in_bytes        # x block (double buffered)
        ws += 2 * bt * tl * Hp * out_bytes      # output block (double buffered)
        ws += 2 * Hp * H2p * in_bytes           # w1 (resident, counted x2)
        ws += 2 * H2p * tl * in_bytes           # w2 tile (double buffered)
        ws += 2 * (H2p + tl) * 4                # biases
        ws += bt * S * H2p * in_bytes           # t scratch
        ws += bt * S * H2p * 4                  # f32 pre-tanh temporary
        ws += 3 * bt * S * tl * 4               # logits / exp / attn temporaries
        ws += bt * tl * Hp * 4                  # f32 bmm result before cast
        return ws

    for tl in tl_candidates:
        for bt in divisors_desc(B, max_bt):
            if working_set(bt, tl) <= vmem_budget:
                return bt, tl, Lp
    # Fallback: smallest tiles (may spill; softmax is over full S so S cannot
    # be tiled without an online-softmax rewrite).
    return 1, 128, Lp


# ----------------------------------------------------------------------------
# wrapper
# ----------------------------------------------------------------------------
def label_attention(hidden_states, w1, b1, w2, b2, *,
                    matmul_dtype=jnp.bfloat16, out_dtype=None,
                    approx_recip=True):
    """hidden_states: [B, S, H] (also accepts [B, H] or [B, d1, d2, H]).

    w1: [H, H//2], b1: [H//2] or [1, H//2], w2: [H//2, L], b2: [L] or [1, L]
    (weights stored [in, out] so the kernel computes x @ W + b).
    Returns [B, L, H] in `out_dtype` (defaults to matmul_dtype).
    """
    shp = hidden_states.shape
    if len(shp) == 4:
        b_, d1, d2, h = shp
        hidden_states = hidden_states.reshape(b_, d1 * d2, h)
    elif len(shp) == 2:
        hidden_states = hidden_states[:, None, :]
    elif len(shp) != 3:
        # TODO(synk): torch module logs and returns zeros here; we raise instead.
        raise ValueError(f"Unexpected tensor shape: {shp}")

    if out_dtype is None:
        out_dtype = matmul_dtype

    B, S, H = hidden_states.shape
    H2 = w1.shape[1]
    L = w2.shape[1]

    # Pad every GEMM dim to a 128 multiple (lane-dense loads/stores, full MXU).
    Hp = _round_up(H, 128)
    H2p = _round_up(H2, 128)

    vmem_cap, vmem_limit, num_cores = _tpu_config()
    in_bytes = jnp.dtype(matmul_dtype).itemsize
    out_bytes = jnp.dtype(out_dtype).itemsize
    Bt, tL, Lp = _pick_tiles(B, S, Hp, H2p, L, in_bytes, out_bytes,
                             int(vmem_limit * 3 // 4), num_cores)
    nB, nL = B // Bt, Lp // tL

    # Cast + zero-pad operands in the wrapper (bf16 halves HBM->VMEM DMA bytes;
    # padded rows/cols of the weights are zero so results are exact after slice).
    x = hidden_states.astype(matmul_dtype)
    if Hp != H:
        x = jnp.pad(x, ((0, 0), (0, 0), (0, Hp - H)))
    w1p = jnp.zeros((Hp, H2p), matmul_dtype).at[:H, :H2].set(
        w1.astype(matmul_dtype))
    b1p = jnp.zeros((1, H2p), jnp.float32).at[0, :H2].set(
        b1.reshape(-1).astype(jnp.float32))
    w2p = jnp.zeros((H2p, Lp), matmul_dtype).at[:H2, :L].set(
        w2.astype(matmul_dtype))
    b2p = jnp.zeros((1, Lp), jnp.float32).at[0, :L].set(
        b2.reshape(-1).astype(jnp.float32))

    kernel = _make_kernel(Bt, S, Hp, matmul_dtype, approx_recip)

    grid_spec = pltpu.PrefetchScalarGridSpec(
        num_scalar_prefetch=0,
        grid=(nB, nL),
        in_specs=[
            pl.BlockSpec((Bt, S, Hp), lambda bi, li: (bi, 0, 0)),   # x
            pl.BlockSpec((Hp, H2p), lambda bi, li: (0, 0)),         # w1 (resident)
            pl.BlockSpec((1, H2p), lambda bi, li: (0, 0)),          # b1 (resident)
            pl.BlockSpec((H2p, tL), lambda bi, li: (0, li)),        # w2 tile
            pl.BlockSpec((1, tL), lambda bi, li: (0, li)),          # b2 tile
        ],
        out_specs=pl.BlockSpec((Bt, tL, Hp), lambda bi, li: (bi, li, 0)),
        scratch_shapes=[pltpu.VMEM((Bt * S, H2p), matmul_dtype)],
    )

    out = pl.pallas_call(
        kernel,
        out_shape=jax.ShapeDtypeStruct((B, Lp, Hp), out_dtype),
        grid_spec=grid_spec,
        # Label axis must stay "arbitrary" (sequential) for the t_ref reuse.
        compiler_params=pltpu.CompilerParams(
            dimension_semantics=("parallel", "arbitrary"),
            vmem_limit_bytes=vmem_limit,
        ),
    )(x, w1p, b1p, w2p, b2p)

    if Lp != L or Hp != H:
        out = out[:, :L, :H]
    return out


def label_attention_ref(hidden_states, w1, b1, w2, b2):
    """Pure-JAX reference mirroring the PyTorch forward."""
    t = jnp.tanh(hidden_states @ w1 + b1)          # [B,S,H2]
    a = t @ w2 + b2                                # [B,S,L]
    a = jnp.swapaxes(a, 1, 2)                      # [B,L,S]
    a = jax.nn.softmax(a, axis=-1)
    return a @ hidden_states                       # [B,L,H]


# ----------------------------------------------------------------------------
# self-test
# ----------------------------------------------------------------------------
if __name__ == "__main__":
    def make_inputs(key, B, S, H, L):
        H2 = H // 2
        kx, kw1, kb1, kw2, kb2 = jax.random.split(key, 5)
        x = jax.random.normal(kx, (B, S, H), dtype=jnp.float32)
        # nn.Linear-style init, stored as [in, out] so the kernel does x @ W + b.
        lim1 = 1.0 / (H ** 0.5)
        w1 = jax.random.uniform(kw1, (H, H2), jnp.float32, -lim1, lim1)
        b1 = jax.random.uniform(kb1, (1, H2), jnp.float32, -lim1, lim1)
        lim2 = 1.0 / (H2 ** 0.5)
        w2 = jax.random.uniform(kw2, (H2, L), jnp.float32, -lim2, lim2)
        b2 = jax.random.uniform(kb2, (1, L), jnp.float32, -lim2, lim2)
        return x, w1, b1, w2, b2

    k1, k2 = jax.random.split(jax.random.PRNGKey(0))

    # 1) Small shapes matching the module's intent (batch=2, seq=8, hidden=32,
    #    labels=4) -- precise path (f32 MXU operands, exact recip, f32 output).
    x, w1, b1, w2, b2 = make_inputs(k1, B=2, S=8, H=32, L=4)
    out = label_attention(x, w1, b1, w2, b2,
                          matmul_dtype=jnp.float32, approx_recip=False)
    out = jax.block_until_ready(out)
    ref = label_attention_ref(x, w1, b1, w2, b2)
    assert out.shape == ref.shape == (2, 4, 32)
    assert jnp.allclose(out, ref, atol=1e-4, rtol=1e-4), float(
        jnp.max(jnp.abs(out - ref)))

    # 2) Lane-dense, label-tiled shapes (L=1024 -> two 512-wide label tiles) --
    #    default fast path (bf16 operands cast in the wrapper, approx recip,
    #    bf16 output writeback).
    x2, w12, b12, w22, b22 = make_inputs(k2, B=2, S=256, H=128, L=1024)
    out2 = label_attention(x2, w12, b12, w22, b22)
    out2 = jax.block_until_ready(out2)
    ref2 = label_attention_ref(x2, w12, b12, w22, b22)
    assert out2.shape == ref2.shape == (2, 1024, 128)
    assert jnp.allclose(out2.astype(jnp.float32), ref2,
                        atol=1e-1, rtol=1e-1), float(
        jnp.max(jnp.abs(out2.astype(jnp.float32) - ref2)))

    print("KERNEL_OK")
</pallas_src>

<mosaic_0001>
module attributes {stable_mosaic.version = 11 : i64} {
  func.func @kernel(%arg0: i32, %arg1: i32, %arg2: memref<2x8x128xf32, #tpu.memory_space<vmem>>, %arg3: memref<128x128xf32, #tpu.memory_space<vmem>>, %arg4: memref<1x128xf32, #tpu.memory_space<vmem>>, %arg5: memref<128x128xf32, #tpu.memory_space<vmem>>, %arg6: memref<1x128xf32, #tpu.memory_space<vmem>>, %arg7: memref<2x128x128xf32, #tpu.memory_space<vmem>>, %arg8: memref<16x128xf32, #tpu.memory_space<vmem>>) attributes {dimension_semantics = [#tpu.dimension_semantics<parallel>, #tpu.dimension_semantics<arbitrary>], iteration_bounds = array<i64: 1, 1>, scalar_prefetch = 0 : i64, scratch_operands = 1 : i64, tpu.core_type = #tpu.core_type<tc>, window_params = [{transform_indices = @transform_0, window_bounds = array<i64: 2, 8, 128>}, {pipeline_mode = #tpu.pipeline_mode<synchronous>, transform_indices = @transform_1, window_bounds = array<i64: 128, 128>}, {pipeline_mode = #tpu.pipeline_mode<synchronous>, transform_indices = @transform_2, window_bounds = array<i64: 1, 128>}, {transform_indices = @transform_3, window_bounds = array<i64: 128, 128>}, {transform_indices = @transform_4, window_bounds = array<i64: 1, 128>}, {transform_indices = @transform_5, window_bounds = array<i64: 2, 128, 128>}]} {
    %c0_i32 = arith.constant 0 : i32
    %0 = arith.cmpi eq, %arg1, %c0_i32 : i32
    %1 = arith.extui %0 : i1 to i32
    %c0_i32_0 = arith.constant 0 : i32
    %2 = arith.cmpi ne, %1, %c0_i32_0 : i32
    scf.if %2 {
      %c0_21 = arith.constant 0 : index
      %c0_22 = arith.constant 0 : index
      %c0_23 = arith.constant 0 : index
      %36 = vector.load %arg2[%c0_21, %c0_22, %c0_23] : memref<2x8x128xf32, #tpu.memory_space<vmem>>, vector<2x8x128xf32>
      %37 = vector.shape_cast %36 : vector<2x8x128xf32> to vector<16x128xf32>
      %c0_24 = arith.constant 0 : index
      %c0_25 = arith.constant 0 : index
      %38 = vector.load %arg3[%c0_24, %c0_25] : memref<128x128xf32, #tpu.memory_space<vmem>>, vector<128x128xf32>
      %cst_26 = arith.constant dense<0.000000e+00> : vector<16x128xf32>
      %39 = tpu.matmul %37, %38, %cst_26 {dimension_numbers = #tpu.dot_dimension_numbers<[1], [0], [0], [1], [0, 0, 1, 1], [], []>} : vector<16x128xf32>, vector<128x128xf32>, vector<16x128xf32> -> vector<16x128xf32>
      %c0_27 = arith.constant 0 : index
      %c0_28 = arith.constant 0 : index
      %40 = vector.load %arg4[%c0_27, %c0_28] : memref<1x128xf32, #tpu.memory_space<vmem>>, vector<1x128xf32>
      %41 = vector.broadcast %40 : vector<1x128xf32> to vector<16x128xf32>
      %42 = arith.addf %39, %41 : vector<16x128xf32>
      %43 = math.tanh %42 : vector<16x128xf32>
      %c0_29 = arith.constant 0 : index
      %c0_30 = arith.constant 0 : index
      %44 = vector.load %arg8[%c0_29, %c0_30] : memref<16x128xf32, #tpu.memory_space<vmem>>, vector<16x128xf32>
      tpu.vector_store %arg8[%c0_29, %c0_30], %43 {strides = array<i32>} : memref<16x128xf32, #tpu.memory_space<vmem>>, vector<16x128xf32>,
    } else {
    }
    %c0 = arith.constant 0 : index
    %c0_1 = arith.constant 0 : index
    %3 = vector.load %arg8[%c0, %c0_1] : memref<16x128xf32, #tpu.memory_space<vmem>>, vector<16x128xf32>
    %c0_2 = arith.constant 0 : index
    %c0_3 = arith.constant 0 : index
    %4 = vector.load %arg5[%c0_2, %c0_3] : memref<128x128xf32, #tpu.memory_space<vmem>>, vector<128x128xf32>
    %cst = arith.constant dense<0.000000e+00> : vector<16x128xf32>
    %5 = tpu.matmul %3, %4, %cst {dimension_numbers = #tpu.dot_dimension_numbers<[1], [0], [0], [1], [0, 0, 1, 1], [], []>} : vector<16x128xf32>, vector<128x128xf32>, vector<16x128xf32> -> vector<16x128xf32>
    %c0_4 = arith.constant 0 : index
    %c0_5 = arith.constant 0 : index
    %6 = vector.load %arg6[%c0_4, %c0_5] : memref<1x128xf32, #tpu.memory_space<vmem>>, vector<1x128xf32>
    %7 = vector.broadcast %6 : vector<1x128xf32> to vector<16x128xf32>
    %8 = arith.addf %5, %7 : vector<16x128xf32>
    %9 = vector.shape_cast %8 : vector<16x128xf32> to vector<2x8x128xf32>
    %cst_6 = arith.constant dense<0xFF800000> : vector<2x128xf32>
    %10 = vector.multi_reduction <maximumf>, %9, %cst_6 [1] : vector<2x8x128xf32> to vector<2x128xf32>
    %11 = vector.shape_cast %10 : vector<2x128xf32> to vector<2x1x128xf32>
    %12 = vector.broadcast %11 : vector<2x1x128xf32> to vector<2x8x128xf32>
    %13 = arith.subf %9, %12 : vector<2x8x128xf32>
    %14 = math.exp %13 : vector<2x8x128xf32>
    %cst_7 = arith.constant dense<0.000000e+00> : vector<2x128xf32>
    %15 = vector.multi_reduction <add>, %14, %cst_7 [1] : vector<2x8x128xf32> to vector<2x128xf32>
    %16 = vector.shape_cast %15 : vector<2x128xf32> to vector<2x1x128xf32>
    %17 = tpu.reciprocal %16 : vector<2x1x128xf32> -> vector<2x1x128xf32>
    %18 = vector.broadcast %17 : vector<2x1x128xf32> to vector<2x8x128xf32>
    %19 = arith.mulf %14, %18 : vector<2x8x128xf32>
    %20 = vector.extract_strided_slice %19 {offsets = [0, 0, 0], sizes = [1, 8, 128], strides = [1, 1, 1]} : vector<2x8x128xf32> to vector<1x8x128xf32>
    %21 = vector.shape_cast %20 : vector<1x8x128xf32> to vector<8x128xf32>
    %c0_8 = arith.constant 0 : index
    %c0_9 = arith.constant 0 : index
    %c0_10 = arith.constant 0 : index
    %22 = vector.load %arg2[%c0_8, %c0_9, %c0_10] : memref<2x8x128xf32, #tpu.memory_space<vmem>>, vector<1x8x128xf32>
    %23 = vector.shape_cast %22 : vector<1x8x128xf32> to vector<8x128xf32>
    %cst_11 = arith.constant dense<0.000000e+00> : vector<128x128xf32>
    %24 = tpu.matmul %21, %23, %cst_11 {dimension_numbers = #tpu.dot_dimension_numbers<[0], [0], [1], [1], [0, 1, 1, 1], [], []>} : vector<8x128xf32>, vector<8x128xf32>, vector<128x128xf32> -> vector<128x128xf32>
    %c0_12 = arith.constant 0 : index
    %c0_13 = arith.constant 0 : index
    %c0_14 = arith.constant 0 : index
    %25 = vector.load %arg7[%c0_12, %c0_13, %c0_14] : memref<2x128x128xf32, #tpu.memory_space<vmem>>, vector<1x128x128xf32>
    %26 = vector.shape_cast %25 : vector<1x128x128xf32> to vector<128x128xf32>
    %27 = vector.shape_cast %24 : vector<128x128xf32> to vector<1x128x128xf32>
    tpu.vector_store %arg7[%c0_12, %c0_13, %c0_14], %27 {strides = array<i32>} : memref<2x128x128xf32, #tpu.memory_space<vmem>>, vector<1x128x128xf32>,
    %28 = vector.extract_strided_slice %19 {offsets = [1, 0, 0], sizes = [1, 8, 128], strides = [1, 1, 1]} : vector<2x8x128xf32> to vector<1x8x128xf32>
    %29 = vector.shape_cast %28 : vector<1x8x128xf32> to vector<8x128xf32>
    %c1 = arith.constant 1 : index
    %c0_15 = arith.constant 0 : index
    %c0_16 = arith.constant 0 : index
    %30 = vector.load %arg2[%c1, %c0_15, %c0_16] : memref<2x8x128xf32, #tpu.memory_space<vmem>>, vector<1x8x128xf32>
    %31 = vector.shape_cast %30 : vector<1x8x128xf32> to vector<8x128xf32>
    %cst_17 = arith.constant dense<0.000000e+00> : vector<128x128xf32>
    %32 = tpu.matmul %29, %31, %cst_17 {dimension_numbers = #tpu.dot_dimension_numbers<[0], [0], [1], [1], [0, 1, 1, 1], [], []>} : vector<8x128xf32>, vector<8x128xf32>, vector<128x128xf32> -> vector<128x128xf32>
    %c1_18 = arith.constant 1 : index
    %c0_19 = arith.constant 0 : index
    %c0_20 = arith.constant 0 : index
    %33 = vector.load %arg7[%c1_18, %c0_19, %c0_20] : memref<2x128x128xf32, #tpu.memory_space<vmem>>, vector<1x128x128xf32>
    %34 = vector.shape_cast %33 : vector<1x128x128xf32> to vector<128x128xf32>
    %35 = vector.shape_cast %32 : vector<128x128xf32> to vector<1x128x128xf32>
    tpu.vector_store %arg7[%c1_18, %c0_19, %c0_20], %35 {strides = array<i32>} : memref<2x128x128xf32, #tpu.memory_space<vmem>>, vector<1x128x128xf32>,
    return
  }
  func.func @transform_0(%arg0: i32, %arg1: i32) -> (i32, i32, i32) {
    %c0_i32 = arith.constant 0 : i32
    %c0_i32_0 = arith.constant 0 : i32
    %c0_i32_1 = arith.constant 0 : i32
    return %arg0, %c0_i32, %c0_i32_0 : i32, i32, i32
  }
  func.func @transform_1(%arg0: i32, %arg1: i32) -> (i32, i32) {
    %c0_i32 = arith.constant 0 : i32
    %c0_i32_0 = arith.constant 0 : i32
    %c0_i32_1 = arith.constant 0 : i32
    return %c0_i32, %c0_i32_0 : i32, i32
  }
  func.func @transform_2(%arg0: i32, %arg1: i32) -> (i32, i32) {
    %c0_i32 = arith.constant 0 : i32
    %c0_i32_0 = arith.constant 0 : i32
    %c0_i32_1 = arith.constant 0 : i32
    return %c0_i32, %c0_i32_0 : i32, i32
  }
  func.func @transform_3(%arg0: i32, %arg1: i32) -> (i32, i32) {
    %c0_i32 = arith.constant 0 : i32
    %c0_i32_0 = arith.constant 0 : i32
    return %c0_i32, %arg1 : i32, i32
  }
  func.func @transform_4(%arg0: i32, %arg1: i32) -> (i32, i32) {
    %c0_i32 = arith.constant 0 : i32
    %c0_i32_0 = arith.constant 0 : i32
    return %c0_i32, %arg1 : i32, i32
  }
  func.func @transform_5(%arg0: i32, %arg1: i32) -> (i32, i32, i32) {
    %c0_i32 = arith.constant 0 : i32
    %c0_i32_0 = arith.constant 0 : i32
    return %arg0, %arg1, %c0_i32 : i32, i32, i32
  }
}

</mosaic_0001>

<bundles_post_ra>
// kernel: tpu_custom_call.1
= control target key start
LH: loop header
LB: loop body
LE: loop exit
PB: predicated region body
PF: predicated region fallthrough
CT: control target
= control target key end

     0   :  { %10 = vsyncpa [#allocation4], 0  ;;  %s1445_s0 = inlined_call_operand.hbm [shape: f32[2,8,128], index: 0, kind: input, shape index: {}]   ;;  %s1446_s1 = inlined_call_operand.hbm [shape: f32[128,128], index: 1, kind: input, shape index: {}]   ;;  %s1447_s2 = inlined_call_operand.hbm [shape: f32[1,128], index: 2, kind: input, shape index: {}]   ;;  %s1448_s3 = inlined_call_operand.hbm [shape: f32[128,128], index: 3, kind: input, shape index: {}]   ;;  %s1449_s4 = inlined_call_operand.hbm [shape: f32[1,128], index: 4, kind: input, shape index: {}]   ;;  %s1450_s5 = inlined_call_operand.hbm [shape: f32[2,128,128], index: 5, kind: output, shape index: {}]  }
   0x1   :  { %11 = vsyncpa [#allocation7], 0 }
   0x2   :  { %12 = vsyncpa [#allocation10], 0 }
   0x3   :  { %13 = vsyncpa [#allocation5], 0  ;;  %s1284_s18 = smov [#allocation6]   ;;  %s1285_s20 = smov [#allocation9]  }
   0x4   :  { %s31_s19 = sshll.u32 %s1284_s18, 4  ;;  %s53_s21 = sshll.u32 %s1285_s20, 4  ;;  %s32_s19 = int_to_ptr.vmem [resolvable:$true] %s31_s19  ;;  %s1322_s21 = int_to_ptr.vmem [resolvable:$true] %s53_s21 }
   0x5   :  { %s1144_s24 = scalar_lea.hbm %s1446_s1, 2048 }
   0x6   :  { %p1145_p0 = scmp.ne.s32.totalorder %s1446_s1, %s1144_s24  ;;  %p1148_p1 = scmp.lt.u32.totalorder %s1144_s24, %s1446_s1 }
   0x8   :  { %p1150_p2 = pnand %p1148_p1, %p1145_p0 }
   0xa   :  { %1153 = shalt.err (!%p1150_p2)
}
   0xb   :  { %s1154_s29 = scalar_lea.vmem %s32_s19, 2048  ;;  %p1159_p4 = scmp.lt.s32.totalorder %s32_s19, %s32_s19 }
   0xc   :  { %p1155_p3 = scmp.ne.s32.totalorder %s32_s19, %s1154_s29  ;;  %p1160_p5 = scmp.lt.s32.totalorder %s1154_s29, %s1154_s29 }
   0xe   :  { %p1161_p6 = por %p1160_p5, %p1159_p4 }
  0x10   :  { %p1162_p7 = pnand %p1161_p6, %p1155_p3 }
  0x12   :  { %1165 = shalt.err (!%p1162_p7)
}
  0x13   :  { %s1286_s30 = smov 128   ;;  %s1287_s6 = smov 8  }
  0x14   :  { %37 = dma.hbm_to_vmem [thread:$0]  %s1446_s1, 2048, %s32_s19, [#allocation7], %s1286_s30, %s1286_s30, %s1287_s6  }
  0x15   :  { %s1166_s11 = scalar_lea.hbm %s1448_s3, 2048 }
  0x16   :  { %p1167_p8 = scmp.ne.s32.totalorder %s1448_s3, %s1166_s11  ;;  %p1170_p9 = scmp.lt.u32.totalorder %s1166_s11, %s1448_s3 }
  0x18   :  { %p1172_p10 = pnand %p1170_p9, %p1167_p8 }
  0x1a   :  { %1175 = shalt.err (!%p1172_p10)
}
  0x1b   :  { %s1176_s16 = scalar_lea.vmem %s1322_s21, 2048  ;;  %p1181_p12 = scmp.lt.s32.totalorder %s1322_s21, %s1322_s21 }
  0x1c   :  { %p1177_p11 = scmp.ne.s32.totalorder %s1322_s21, %s1176_s16  ;;  %p1182_p13 = scmp.lt.s32.totalorder %s1176_s16, %s1176_s16 }
  0x1e   :  { %p1183_p0 = por %p1182_p13, %p1181_p12 }
  0x20   :  { %p1184_p1 = pnand %p1183_p0, %p1177_p11 }
  0x22   :  { %1187 = shalt.err (!%p1184_p1)
}
  0x23   :  { %59 = dma.hbm_to_vmem [thread:$0]  %s1448_s3, 2048, %s1322_s21, [#allocation10], %s1286_s30, %s1286_s30, %s1287_s6  }
  0x24   :  { %s1288_s18 = smov [#allocation3]   ;;  %s1289_s20 = smov [#allocation8]  }
  0x25   :  { %s19_s19 = sshll.u32 %s1288_s18, 4  ;;  %s44_s22 = sshll.u32 %s1289_s20, 4  ;;  %s20_s19 = int_to_ptr.vmem [resolvable:$true] %s19_s19  ;;  %s45_s22 = int_to_ptr.vmem [resolvable:$true] %s44_s22 }
  0x26   :  { %s1188_s25 = scalar_lea.hbm %s1445_s0, 256 }
  0x27   :  { %p1189_p2 = scmp.ne.s32.totalorder %s1445_s0, %s1188_s25  ;;  %p1192_p3 = scmp.lt.u32.totalorder %s1188_s25, %s1445_s0 }
  0x29   :  { %p1194_p4 = pnand %p1192_p3, %p1189_p2 }
  0x2b   :  { %1197 = shalt.err (!%p1194_p4)
}
  0x2c   :  { %s1198_s3 = scalar_lea.vmem %s20_s19, 256  ;;  %p1203_p6 = scmp.lt.s32.totalorder %s20_s19, %s20_s19 }
  0x2d   :  { %p1199_p5 = scmp.ne.s32.totalorder %s20_s19, %s1198_s3  ;;  %p1204_p7 = scmp.lt.s32.totalorder %s1198_s3, %s1198_s3 }
  0x2f   :  { %p1205_p8 = por %p1204_p7, %p1203_p6 }
  0x31   :  { %p1206_p9 = pnand %p1205_p8, %p1199_p5 }
  0x33   :  { %1209 = shalt.err (!%p1206_p9)
}
  0x34   :  { %25 = dma.hbm_to_vmem [thread:$0]  %s1445_s0, 256, %s20_s19, [#allocation4], %s1286_s30, %s1286_s30, %s1287_s6  }
  0x35   :  { %s1210_s10 = scalar_lea.hbm %s1447_s2, 16 }
  0x36   :  { %p1211_p10 = scmp.ne.s32.totalorder %s1447_s2, %s1210_s10  ;;  %p1214_p11 = scmp.lt.u32.totalorder %s1210_s10, %s1447_s2 }
  0x38   :  { %p1216_p12 = pnand %p1214_p11, %p1211_p10 }
  0x3a   :  { %1219 = shalt.err (!%p1216_p12)
}
  0x3b   :  { %s1220_s15 = scalar_lea.vmem %s45_s22, 16  ;;  %s1224_s16 = scalar_lea.vmem %s45_s22, 32 }
  0x3c   :  { %p1221_p13 = scmp.ne.s32.totalorder %s45_s22, %s1220_s15  ;;  %p1225_p0 = scmp.lt.s32.totalorder %s45_s22, %s45_s22 }
  0x3d   :  { %p1226_p1 = scmp.lt.s32.totalorder %s1224_s16, %s1220_s15 }
  0x3f   :  { %p1227_p2 = por %p1226_p1, %p1225_p0 }
  0x41   :  { %p1228_p3 = pnand %p1227_p2, %p1221_p13 }
  0x43   :  { %1231 = shalt.err (!%p1228_p3)
}
  0x44   :  { %47 = dma.hbm_to_vmem [thread:$0]  %s1447_s2, 16, %s45_s22, [#allocation7]  }
  0x45   :  { %s1290_s17 = smov [#allocation11]   ;;  %s1232_s23 = scalar_lea.hbm %s1449_s4, 16 }
  0x46   :  { %s66_s18 = sshll.u32 %s1290_s17, 4  ;;  %p1233_p4 = scmp.ne.s32.totalorder %s1449_s4, %s1232_s23  ;;  %s67_s18 = int_to_ptr.vmem [resolvable:$true] %s66_s18 }
  0x47   :  { %p1236_p5 = scmp.lt.u32.totalorder %s1232_s23, %s1449_s4 }
  0x49   :  { %p1238_p6 = pnand %p1236_p5, %p1233_p4 }
  0x4b   :  { %1241 = shalt.err (!%p1238_p6)
}
  0x4c   :  { %s1242_s28 = scalar_lea.vmem %s67_s18, 16  ;;  %s1246_s2 = scalar_lea.vmem %s67_s18, 32 }
  0x4d   :  { %p1243_p7 = scmp.ne.s32.totalorder %s67_s18, %s1242_s28  ;;  %p1247_p8 = scmp.lt.s32.totalorder %s67_s18, %s67_s18 }
  0x4e   :  { %p1248_p9 = scmp.lt.s32.totalorder %s1246_s2, %s1242_s28 }
  0x50   :  { %p1249_p10 = por %p1248_p9, %p1247_p8 }
  0x52   :  { %p1250_p11 = pnand %p1249_p10, %p1243_p7 }
  0x54   :  { %1253 = shalt.err (!%p1250_p11)
}
  0x55   :  { %69 = dma.hbm_to_vmem [thread:$0]  %s1449_s4, 16, %s67_s18, [#allocation10]  }
  0x56   :  { %1276 = dma.done.wait [#allocation4], 256  }
  0x57   :  { %1277 = vsyncadd [#allocation4], 4294967040 }
  0x58   :  { %1278 = dma.done.wait [#allocation7], 2064  }
  0x59   :  { %1279 = vsyncadd [#allocation7], 4294965232 }
  0x5a   :  { %1280 = dma.done.wait [#allocation10], 2064  }
  0x5b   :  { %1281 = vsyncadd [#allocation10], 4294965232  ;;  %v91_v0 = vld [vmem:[#allocation6] sm:$0xff]  ;;  %v92_v1 = vld [vmem:[#allocation6 + $0x8] sm:$0xff]  ;;  %vm360_vm0 = vcmask 64512   ;;  %s1291_s4 = smov [#allocation12]  }
  0x5c   :  { %v93_v2 = vld [vmem:[#allocation6 + $0x10] sm:$0xff]  ;;  %v1059_v3 = vpack.c.bf16 %v92_v1, %v91_v0  ;;  %v94_v4 = vld [vmem:[#allocation6 + $0x18] sm:$0xff]  ;;  %v95_v6 = vld [vmem:[#allocation6 + $0x20] sm:$0xff]  ;;  %s819_s3 = sshll.u32 %s1291_s4, 4  ;;  %s820_s3 = int_to_ptr.vmem [resolvable:$true] %s819_s3 }
  0x5d   :  { %v1063_v5 = vpack.c.bf16 %v94_v4, %v93_v2  ;;  %v96_v7 = vld [vmem:[#allocation6 + $0x28] sm:$0xff]  ;;  %v97_v9 = vld [vmem:[#allocation6 + $0x30] sm:$0xff]  ;;  %v98_v10 = vld [vmem:[#allocation6 + $0x38] sm:$0xff]  ;;  %s1254_s21 = scalar_lea.vmem %s820_s3, 4096  ;;  %p1259_p13 = scmp.lt.s32.totalorder %s820_s3, %s820_s3 }
  0x5e   :  { %1060 = vmatprep.subr.bf16.mxu0 %v1059_v3  ;;  %v1067_v8 = vpack.c.bf16 %v96_v7, %v95_v6  ;;  %v89_v11 = vld [vmem:[#allocation3] sm:$0xff]  ;;  %v195_v12 = vld [vmem:[#allocation9] sm:$0xff]  ;;  %v198_v16 = vld [vmem:[#allocation9 + $0x18] sm:$0xff]  ;;  %v1071_v20 = vpack.c.bf16 %v98_v10, %v97_v9  ;;  %p1255_p12 = scmp.ne.s32.totalorder %s820_s3, %s1254_s21  ;;  %p1260_p0 = scmp.lt.s32.totalorder %s1254_s21, %s1254_s21 }
  0x5f   :  { %1062 = vmatpush3.bf16.msra.mxu0 %v1059_v3  ;;  %969 = vmatprep.mubr.f32.mxu0 %v89_v11  ;;  %v196_v13 = vld [vmem:[#allocation9 + $0x8] sm:$0xff]  ;;  %v197_v14 = vld [vmem:[#allocation9 + $0x10] sm:$0xff]  ;;  %v199_v18 = vld [vmem:[#allocation9 + $0x20] sm:$0xff] }
  0x60   :  { %1064 = vmatprep.subr.bf16.mxu0 %v1063_v5  ;;  %v1091_v15 = vpack.c.bf16 %v196_v13, %v195_v12  ;;  %v1095_v17 = vpack.c.bf16 %v198_v16, %v197_v14  ;;  %v200_v19 = vld [vmem:[#allocation9 + $0x28] sm:$0xff]  ;;  %v99_v21 = vld [vmem:[#allocation6 + $0x40] sm:$0xff]  ;;  %v201_v24 = vld [vmem:[#allocation9 + $0x30] sm:$0xff]  ;;  %p1261_p1 = por %p1260_p0, %p1259_p13 }
  0x61   :  { %v100_v22 = vld [vmem:[#allocation6 + $0x48] sm:$0xff]  ;;  %v1099_v23 = vpack.c.bf16 %v200_v19, %v199_v18  ;;  %v202_v25 = vld [vmem:[#allocation9 + $0x38] sm:$0xff]  ;;  %v101_v27 = vld [vmem:[#allocation6 + $0x50] sm:$0xff] }
  0x62   :  { %1092 = vmatprep.subr.bf16.mxu1 %v1091_v15  ;;  %v1075_v26 = vpack.c.bf16 %v100_v22, %v99_v21  ;;  %v102_v28 = vld [vmem:[#allocation6 + $0x58] sm:$0xff]  ;;  %v1103_v29 = vpack.c.bf16 %v202_v25, %v201_v24  ;;  %v103_v31 = vld [vmem:[#allocation6 + $0x60] sm:$0xff]  ;;  %v104_v32 = vld [vmem:[#allocation6 + $0x68] sm:$0xff]  ;;  %p1262_p2 = pnand %p1261_p1, %p1255_p12 }
  0x63   :  { %1066 = vmatpush3.bf16.msra.mxu0 %v1063_v5  ;;  %1094 = vmatpush3.bf16.msra.mxu1 %v1091_v15  ;;  %v1079_v30 = vpack.c.bf16 %v102_v28, %v101_v27  ;;  %v1083_v33 = vpack.c.bf16 %v104_v32, %v103_v31  ;;  %v105_v34 = vld [vmem:[#allocation6 + $0x70] sm:$0xff]  ;;  %v106_v35 = vld [vmem:[#allocation6 + $0x78] sm:$0xff]  ;;  %v203_v38 = vld [vmem:[#allocation9 + $0x40] sm:$0xff] }
  0x64   :  { %1068 = vmatprep.subr.bf16.mxu0 %v1067_v8  ;;  %1096 = vmatprep.subr.bf16.mxu1 %v1095_v17  ;;  %v1087_v36 = vpack.c.bf16 %v106_v35, %v105_v34  ;;  %v90_v37 = vld [vmem:[#allocation3 + $0x8] sm:$0xff]  ;;  %v204_v39 = vld [vmem:[#allocation9 + $0x48] sm:$0xff]  ;;  %v207_v44 = vld [vmem:[#allocation9 + $0x60] sm:$0xff] }
  0x65   :  { %v1107_v40 = vpack.c.bf16 %v204_v39, %v203_v38  ;;  %v205_v41 = vld [vmem:[#allocation9 + $0x50] sm:$0xff]  ;;  %v206_v42 = vld [vmem:[#allocation9 + $0x58] sm:$0xff]  ;;  %v208_v45 = vld [vmem:[#allocation9 + $0x68] sm:$0xff] }
  0x66   :  { %v1111_v43 = vpack.c.bf16 %v206_v42, %v205_v41  ;;  %v209_v46 = vld [vmem:[#allocation9 + $0x70] sm:$0xff]  ;;  %v1115_v47 = vpack.c.bf16 %v208_v45, %v207_v44  ;;  %v210_v48 = vld [vmem:[#allocation9 + $0x78] sm:$0xff]  ;;  %v834_v57 = vld [vmem:[#allocation11] ss:$0 sm:$0xff] }
  0x67   :  { %1070 = vmatpush3.bf16.msra.mxu0 %v1067_v8  ;;  %1098 = vmatpush3.bf16.msra.mxu1 %v1095_v17  ;;  %v1119_v49 = vpack.c.bf16 %v210_v48, %v209_v46  ;;  %v833_v50 = vld [vmem:[#allocation8] ss:$0 sm:$0xff] }
  0x68   :  { %1072 = vmatprep.subr.bf16.mxu0 %v1071_v20  ;;  %1100 = vmatprep.subr.bf16.mxu1 %v1099_v23 }
  0x6b   :  { %1074 = vmatpush3.bf16.msra.mxu0 %v1071_v20  ;;  %1102 = vmatpush3.bf16.msra.mxu1 %v1099_v23 }
  0x6c   :  { %1076 = vmatprep.subr.bf16.mxu0 %v1075_v26  ;;  %1104 = vmatprep.subr.bf16.mxu1 %v1103_v29 }
  0x6f   :  { %1078 = vmatpush3.bf16.msra.mxu0 %v1075_v26  ;;  %1106 = vmatpush3.bf16.msra.mxu1 %v1103_v29 }
  0x70   :  { %1080 = vmatprep.subr.bf16.mxu0 %v1079_v30  ;;  %1108 = vmatprep.subr.bf16.mxu1 %v1107_v40 }
  0x73   :  { %1082 = vmatpush3.bf16.msra.mxu0 %v1079_v30  ;;  %1110 = vmatpush3.bf16.msra.mxu1 %v1107_v40 }
  0x74   :  { %1084 = vmatprep.subr.bf16.mxu0 %v1083_v33  ;;  %1112 = vmatprep.subr.bf16.mxu1 %v1111_v43 }
  0x77   :  { %1086 = vmatpush3.bf16.msra.mxu0 %v1083_v33  ;;  %1114 = vmatpush3.bf16.msra.mxu1 %v1111_v43 }
  0x78   :  { %1088 = vmatprep.subr.bf16.mxu0 %v1087_v36  ;;  %1116 = vmatprep.subr.bf16.mxu1 %v1115_v47 }
  0x7b   :  { %1090 = vmatpush3.bf16.msra.mxu0 %v1087_v36  ;;  %1118 = vmatpush3.bf16.msra.mxu1 %v1115_v47 }
  0x7c   :  { %1007 = vmatprep.subr.mxu0 %v89_v11  ;;  %1120 = vmatprep.subr.bf16.mxu1 %v1119_v49 }
  0x7e   :  { %970 = vmatmul.mubr.f32.vlgmr.msra.gmra.mrb[0].mxu0 %v90_v37 }
  0x7f   :  { %1008 = vmatpush3.msra.mxu0 %v89_v11  ;;  %1122 = vmatpush3.bf16.msra.mxu1 %v1119_v49 }
  0x80   :  { %1033 = vmatprep.subr.mxu1 %v90_v37 }
 0x151   :  { %v971_v51 = vpop.f32.mrb[0].mxu0 }
 0x152   :  { %v186_v52 = vadd.f32 %v971_v51, %v833_v50  ;;  %v180_v53 = vpop.f32.mrb[1].mxu0 }
 0x153   :  { %v181_v54 = vadd.f32 %v833_v50, %v180_v53 }
 0x155   :  { %1132 = vtanh.f32 %v181_v54 }
 0x156   :  { %1134 = vtanh.f32 %v186_v52 }
 0x15f   :  { %v1133_v55 = vpop.eup %1132 }
 0x160   :  { %v1135_v56 = vpop.eup %1134  ;;  %1004 = vmatprep.mubr.f32.mxu1 %v1133_v55 }
 0x161   :  { %1005 = vmatmul.mubr.f32.vlgmr.msra.gmra.mrb[0].mxu1 %v1135_v56 }
 0x162   :  { %1034 = vmatpush3.msra.mxu1 %v90_v37 }
 0x234   :  { %v1006_v58 = vpop.f32.mrb[0].mxu1 }
 0x235   :  { %v284_v59 = vpop.f32.mrb[1].mxu1  ;;  %v290_v5 = vadd.f32 %v1006_v58, %v834_v57 }
 0x236   :  { %v285_v60 = vadd.f32 %v834_v57, %v284_v59 }
 0x237   :  { %v299_v8 = vrot.slane %v290_v5, 4 }
 0x238   :  { %v293_v61 = vrot.slane %v285_v60, 4 }
 0x239   :  { %v300_v11 = vmax.f32 %v290_v5, %v299_v8 }
 0x23a   :  { %v294_v62 = vmax.f32 %v285_v60, %v293_v61 }
 0x23b   :  { %v301_v14 = vrot.slane %v300_v11, 2 }
 0x23c   :  { %v295_v63 = vrot.slane %v294_v62, 2 }
 0x23d   :  { %v302_v16 = vmax.f32 %v300_v11, %v301_v14 }
 0x23e   :  { %v296_v0 = vmax.f32 %v294_v62, %v295_v63 }
 0x23f   :  { %v303_v17 = vrot.slane %v302_v16, 1 }
 0x240   :  { %v297_v1 = vrot.slane %v296_v0, 1 }
 0x241   :  { %v304_v19 = vmax.f32 %v302_v16, %v303_v17 }
 0x242   :  { %v298_v2 = vmax.f32 %v296_v0, %v297_v1 }
 0x243   :  { %v306_v21 = vsub.f32 %v290_v5, %v304_v19 }
 0x244   :  { %v305_v3 = vsub.f32 %v285_v60, %v298_v2 }
 0x245   :  { %v309_v22 = vmul.f32 1.442695, %v306_v21 }
 0x246   :  { %v307_v4 = vmul.f32 1.442695, %v305_v3 }
 0x248   :  { %1136 = vpow2.f32 %v307_v4 }
 0x252   :  { %v1137_v6 = vpop.eup %1136 }
 0x253   :  { %v311_v7 = vrot.slane %v1137_v6, 4 }
 0x255   :  { %v312_v9 = vadd.f32 %v1137_v6, %v311_v7 }
 0x257   :  { %v313_v10 = vrot.slane %v312_v9, 2 }
 0x259   :  { %v314_v12 = vadd.f32 %v313_v10, %v312_v9 }
 0x25b   :  { %v315_v13 = vrot.slane %v314_v12, 1 }
 0x25d   :  { %v316_v15 = vadd.f32 %v315_v13, %v314_v12 }
 0x25f   :  { %1138 = vrcp.f32 %v316_v15 }
 0x260   :  { %1140 = vpow2.f32 %v309_v22 }
 0x269   :  { %v1139_v18 = vpop.eup %1138 }
 0x26a   :  { %v325_v20 = vmul.f32 %v1139_v18, %v1137_v6  ;;  %v1141_v23 = vpop.eup %1140 }
 0x26b   :  { %v317_v24 = vrot.slane %v1141_v23, 4 }
 0x26c   :  { %328 = vxpose.xlu0.b32.start.end [1/1] (short) %v325_v20, 128 }
 0x26d   :  { %v318_v25 = vadd.f32 %v1141_v23, %v317_v24 }
 0x26f   :  { %v319_v26 = vrot.slane %v318_v25, 2 }
 0x271   :  { %v320_v27 = vadd.f32 %v319_v26, %v318_v25 }
 0x273   :  { %v321_v28 = vrot.slane %v320_v27, 1 }
 0x275   :  { %v322_v29 = vadd.f32 %v321_v28, %v320_v27 }
 0x277   :  { %1142 = vrcp.f32 %v322_v29 }
 0x281   :  { %v1143_v30 = vpop.eup %1142 }
 0x282   :  { %v326_v31 = vmul.f32 %v1143_v30, %v1141_v23 }
 0x2a9   :  { %572 = vxpose.xlu0.b32.start.end [1/1] (short) %v326_v31, 128 }
 0x2ec   :  { %v344_v32 = vpop.trf.xlu0 }
 0x2ed   :  { %1009 = vmatprep.mubr.msk.f32.mxu0 %vm360_vm0, %v344_v32 }
 0x2f0   :  { %v345_v33 = vpop.trf.xlu0 }
 0x2f1   :  { %1010 = vmatmul.mubr.msk.f32.vlgmr.msra.gmra.mrb[2].mxu0 %vm360_vm0, %v345_v33 }
 0x2f4   :  { %v346_v34 = vpop.trf.xlu0 }
 0x2f5   :  { %1012 = vmatprep.mubr.msk.f32.mxu0 %vm360_vm0, %v346_v34 }
 0x2f8   :  { %v347_v35 = vpop.trf.xlu0 }
 0x2f9   :  { %1013 = vmatmul.mubr.msk.f32.gmra.mrb[4].mxu0 %vm360_vm0, %v347_v35 }
 0x2fc   :  { %v348_v36 = vpop.trf.xlu0 }
 0x2fd   :  { %1015 = vmatprep.mubr.msk.f32.mxu0 %vm360_vm0, %v348_v36 }
 0x300   :  { %v349_v37 = vpop.trf.xlu0 }
 0x301   :  { %1016 = vmatmul.mubr.msk.f32.gmra.mrb[6].mxu0 %vm360_vm0, %v349_v37 }
 0x304   :  { %v350_v38 = vpop.trf.xlu0 }
 0x305   :  { %1018 = vmatprep.mubr.msk.f32.mxu0 %vm360_vm0, %v350_v38 }
 0x308   :  { %v351_v39 = vpop.trf.xlu0 }
 0x309   :  { %1019 = vmatmul.mubr.msk.f32.gmra.mrb[8].mxu0 %vm360_vm0, %v351_v39 }
 0x30c   :  { %v352_v40 = vpop.trf.xlu0 }
 0x30d   :  { %1021 = vmatprep.mubr.msk.f32.mxu0 %vm360_vm0, %v352_v40 }
 0x310   :  { %v353_v41 = vpop.trf.xlu0 }
 0x311   :  { %1022 = vmatmul.mubr.msk.f32.gmra.mrb[10].mxu0 %vm360_vm0, %v353_v41 }
 0x314   :  { %v354_v42 = vpop.trf.xlu0 }
 0x315   :  { %1024 = vmatprep.mubr.msk.f32.mxu0 %vm360_vm0, %v354_v42 }
 0x318   :  { %v355_v43 = vpop.trf.xlu0 }
 0x319   :  { %1025 = vmatmul.mubr.msk.f32.gmra.mrb[12].mxu0 %vm360_vm0, %v355_v43 }
 0x31c   :  { %v356_v44 = vpop.trf.xlu0 }
 0x31d   :  { %1027 = vmatprep.mubr.msk.f32.mxu0 %vm360_vm0, %v356_v44 }
 0x320   :  { %v357_v45 = vpop.trf.xlu0 }
 0x321   :  { %1028 = vmatmul.mubr.msk.f32.gmra.mrb[14].mxu0 %vm360_vm0, %v357_v45 }
 0x324   :  { %v358_v46 = vpop.trf.xlu0 }
 0x325   :  { %1030 = vmatprep.mubr.msk.f32.mxu0 %vm360_vm0, %v358_v46 }
 0x328   :  { %v359_v47 = vpop.trf.xlu0 }
 0x329   :  { %1031 = vmatmul.mubr.msk.f32.gmra.mrb[16].mxu0 %vm360_vm0, %v359_v47 }
 0x32c   :  { %v588_v48 = vpop.trf.xlu0 }
 0x32d   :  { %1035 = vmatprep.mubr.msk.f32.mxu1 %vm360_vm0, %v588_v48 }
 0x330   :  { %v589_v49 = vpop.trf.xlu0 }
 0x331   :  { %1036 = vmatmul.mubr.msk.f32.vlgmr.msra.gmra.mrb[2].mxu1 %vm360_vm0, %v589_v49 }
 0x334   :  { %v590_v50 = vpop.trf.xlu0 }
 0x335   :  { %1038 = vmatprep.mubr.msk.f32.mxu1 %vm360_vm0, %v590_v50 }
 0x338   :  { %v591_v51 = vpop.trf.xlu0 }
 0x339   :  { %1039 = vmatmul.mubr.msk.f32.gmra.mrb[4].mxu1 %vm360_vm0, %v591_v51 }
 0x33c   :  { %v592_v52 = vpop.trf.xlu0 }
 0x33d   :  { %1041 = vmatprep.mubr.msk.f32.mxu1 %vm360_vm0, %v592_v52 }
 0x340   :  { %v593_v53 = vpop.trf.xlu0 }
 0x341   :  { %1042 = vmatmul.mubr.msk.f32.gmra.mrb[6].mxu1 %vm360_vm0, %v593_v53 }
 0x344   :  { %v594_v54 = vpop.trf.xlu0 }
 0x345   :  { %1044 = vmatprep.mubr.msk.f32.mxu1 %vm360_vm0, %v594_v54 }
 0x348   :  { %v595_v55 = vpop.trf.xlu0 }
 0x349   :  { %1045 = vmatmul.mubr.msk.f32.gmra.mrb[8].mxu1 %vm360_vm0, %v595_v55 }
 0x34c   :  { %v596_v56 = vpop.trf.xlu0 }
 0x34d   :  { %1047 = vmatprep.mubr.msk.f32.mxu1 %vm360_vm0, %v596_v56 }
 0x350   :  { %v597_v57 = vpop.trf.xlu0 }
 0x351   :  { %1048 = vmatmul.mubr.msk.f32.gmra.mrb[10].mxu1 %vm360_vm0, %v597_v57 }
 0x354   :  { %v598_v58 = vpop.trf.xlu0 }
 0x355   :  { %1050 = vmatprep.mubr.msk.f32.mxu1 %vm360_vm0, %v598_v58 }
 0x358   :  { %v599_v59 = vpop.trf.xlu0 }
 0x359   :  { %1051 = vmatmul.mubr.msk.f32.gmra.mrb[12].mxu1 %vm360_vm0, %v599_v59 }
 0x35c   :  { %v600_v60 = vpop.trf.xlu0 }
 0x35d   :  { %1053 = vmatprep.mubr.msk.f32.mxu1 %vm360_vm0, %v600_v60 }
 0x360   :  { %v601_v61 = vpop.trf.xlu0 }
 0x361   :  { %1054 = vmatmul.mubr.msk.f32.gmra.mrb[14].mxu1 %vm360_vm0, %v601_v61 }
 0x364   :  { %v602_v62 = vpop.trf.xlu0 }
 0x365   :  { %1056 = vmatprep.mubr.msk.f32.mxu1 %vm360_vm0, %v602_v62 }
 0x368   :  { %v603_v63 = vpop.trf.xlu0 }
 0x369   :  { %1057 = vmatmul.mubr.msk.f32.gmra.mrb[16].mxu1 %vm360_vm0, %v603_v63 }
 0x3c4   :  { %v1011_v0 = vpop.f32.mrb[2].mxu0 }
 0x3c5   :  { %555 = vst [vmem:[#allocation12 + $0x8] sm:$0xff] %v1011_v0  ;;  %v475_v1 = vpop.f32.mrb[3].mxu0 }
 0x3c6   :  { %554 = vst [vmem:[#allocation12] sm:$0xff] %v475_v1 }
 0x3cc   :  { %v1014_v2 = vpop.f32.mrb[4].mxu0 }
 0x3cd   :  { %557 = vst [vmem:[#allocation12 + $0x18] sm:$0xff] %v1014_v2  ;;  %v485_v3 = vpop.f32.mrb[5].mxu0 }
 0x3ce   :  { %556 = vst [vmem:[#allocation12 + $0x10] sm:$0xff] %v485_v3 }
 0x3d4   :  { %v1017_v4 = vpop.f32.mrb[6].mxu0 }
 0x3d5   :  { %559 = vst [vmem:[#allocation12 + $0x28] sm:$0xff] %v1017_v4  ;;  %v495_v5 = vpop.f32.mrb[7].mxu0 }
 0x3d6   :  { %558 = vst [vmem:[#allocation12 + $0x20] sm:$0xff] %v495_v5 }
 0x3dc   :  { %v1020_v6 = vpop.f32.mrb[8].mxu0 }
 0x3dd   :  { %561 = vst [vmem:[#allocation12 + $0x38] sm:$0xff] %v1020_v6  ;;  %v505_v7 = vpop.f32.mrb[9].mxu0 }
 0x3de   :  { %560 = vst [vmem:[#allocation12 + $0x30] sm:$0xff] %v505_v7 }
 0x3e4   :  { %v1023_v8 = vpop.f32.mrb[10].mxu0 }
 0x3e5   :  { %563 = vst [vmem:[#allocation12 + $0x48] sm:$0xff] %v1023_v8  ;;  %v515_v9 = vpop.f32.mrb[11].mxu0 }
 0x3e6   :  { %562 = vst [vmem:[#allocation12 + $0x40] sm:$0xff] %v515_v9 }
 0x3ec   :  { %v1026_v10 = vpop.f32.mrb[12].mxu0 }
 0x3ed   :  { %565 = vst [vmem:[#allocation12 + $0x58] sm:$0xff] %v1026_v10  ;;  %v525_v11 = vpop.f32.mrb[13].mxu0 }
 0x3ee   :  { %564 = vst [vmem:[#allocation12 + $0x50] sm:$0xff] %v525_v11 }
 0x3f4   :  { %v1029_v12 = vpop.f32.mrb[14].mxu0 }
 0x3f5   :  { %567 = vst [vmem:[#allocation12 + $0x68] sm:$0xff] %v1029_v12  ;;  %v535_v13 = vpop.f32.mrb[15].mxu0 }
 0x3f6   :  { %566 = vst [vmem:[#allocation12 + $0x60] sm:$0xff] %v535_v13 }
 0x3fc   :  { %v1032_v14 = vpop.f32.mrb[16].mxu0 }
 0x3fd   :  { %569 = vst [vmem:[#allocation12 + $0x78] sm:$0xff] %v1032_v14  ;;  %v545_v15 = vpop.f32.mrb[17].mxu0 }
 0x3fe   :  { %568 = vst [vmem:[#allocation12 + $0x70] sm:$0xff] %v545_v15 }
 0x404   :  { %v1037_v16 = vpop.f32.mrb[2].mxu1 }
 0x405   :  { %799 = vst [vmem:[#allocation12 + $0x88] sm:$0xff] %v1037_v16  ;;  %v718_v17 = vpop.f32.mrb[3].mxu1 }
 0x406   :  { %798 = vst [vmem:[#allocation12 + $0x80] sm:$0xff] %v718_v17 }
 0x40c   :  { %v1040_v18 = vpop.f32.mrb[4].mxu1 }
 0x40d   :  { %801 = vst [vmem:[#allocation12 + $0x98] sm:$0xff] %v1040_v18  ;;  %v728_v19 = vpop.f32.mrb[5].mxu1 }
 0x40e   :  { %800 = vst [vmem:[#allocation12 + $0x90] sm:$0xff] %v728_v19 }
 0x414   :  { %v1043_v20 = vpop.f32.mrb[6].mxu1 }
 0x415   :  { %803 = vst [vmem:[#allocation12 + $0xa8] sm:$0xff] %v1043_v20  ;;  %v738_v21 = vpop.f32.mrb[7].mxu1 }
 0x416   :  { %802 = vst [vmem:[#allocation12 + $0xa0] sm:$0xff] %v738_v21 }
 0x41c   :  { %v1046_v22 = vpop.f32.mrb[8].mxu1 }
 0x41d   :  { %805 = vst [vmem:[#allocation12 + $0xb8] sm:$0xff] %v1046_v22  ;;  %v748_v23 = vpop.f32.mrb[9].mxu1 }
 0x41e   :  { %804 = vst [vmem:[#allocation12 + $0xb0] sm:$0xff] %v748_v23 }
 0x424   :  { %v1049_v24 = vpop.f32.mrb[10].mxu1 }
 0x425   :  { %807 = vst [vmem:[#allocation12 + $0xc8] sm:$0xff] %v1049_v24  ;;  %v758_v25 = vpop.f32.mrb[11].mxu1 }
 0x426   :  { %806 = vst [vmem:[#allocation12 + $0xc0] sm:$0xff] %v758_v25 }
 0x42c   :  { %v1052_v26 = vpop.f32.mrb[12].mxu1 }
 0x42d   :  { %809 = vst [vmem:[#allocation12 + $0xd8] sm:$0xff] %v1052_v26  ;;  %v768_v27 = vpop.f32.mrb[13].mxu1 }
 0x42e   :  { %808 = vst [vmem:[#allocation12 + $0xd0] sm:$0xff] %v768_v27 }
 0x434   :  { %v1055_v28 = vpop.f32.mrb[14].mxu1 }
 0x435   :  { %811 = vst [vmem:[#allocation12 + $0xe8] sm:$0xff] %v1055_v28  ;;  %v778_v29 = vpop.f32.mrb[15].mxu1 }
 0x436   :  { %810 = vst [vmem:[#allocation12 + $0xe0] sm:$0xff] %v778_v29 }
 0x43c   :  { %v1058_v30 = vpop.f32.mrb[16].mxu1 }
 0x43d   :  { %813 = vst [vmem:[#allocation12 + $0xf8] sm:$0xff] %v1058_v30  ;;  %v788_v31 = vpop.f32.mrb[17].mxu1 }
 0x43e   :  { %812 = vst [vmem:[#allocation12 + $0xf0] sm:$0xff] %v788_v31 }
 0x43f   :  { %1265 = shalt.err (!%p1262_p2)
}
 0x440   :  { %s1266_s9 = scalar_lea.hbm %s1450_s5, 4096 }
 0x441   :  { %p1267_p3 = scmp.ne.s32.totalorder %s1450_s5, %s1266_s9  ;;  %p1270_p4 = scmp.lt.u32.totalorder %s1266_s9, %s1450_s5 }
 0x443   :  { %p1272_p5 = pnand %p1270_p4, %p1267_p3 }
 0x445   :  { %1275 = shalt.err (!%p1272_p5)
}
 0x446   :  { %825 = dma.vmem_to_hbm [thread:$0]  %s820_s3, 4096, %s1450_s5, [#allocation5], %s1286_s30, %s1286_s30, %s1287_s6  }
 0x447   :  { %1282 = dma.done.wait [#allocation5], 4096  }
 0x448   :  { %1283 = vsyncadd [#allocation5], 4294963200 }
 0x449   :  { %829 = vsyncpa [#allocation4], 1 }
 0x44a   :  { %830 = vsyncpa [#allocation7], 1 }
 0x44b   :  { %831 = vsyncpa [#allocation10], 1 }
 0x44c   :  { %832 = vsyncpa [#allocation5], 1 }

</bundles_post_ra>
